<compile_context>
chip_gen: v6e
topology: v6e:2x2x1
jax: 0.10.0
libtpu: 0.0.40
codegen_flags: <defaults>
</compile_context>

<pallas_src>
import jax
import jax.numpy as jnp
from jax.experimental import pallas as pl
from jax.experimental.pallas import tpu as pltpu


# ----------------------------- fused kernels --------------------------------


def _hebb_kernel_nomask(x_ref, o_ref):
    # x_ref block: (Bt, C, P), native dtype.
    x = x_ref[...]
    xf = x.astype(jnp.float32)
    amp = jnp.sqrt(jnp.sum(xf * xf, axis=1, keepdims=True) + 1e-8)    # (Bt,1,P)
    ms = jnp.sum(amp, axis=2, keepdims=True)                          # (Bt,1,1)
    s = pl.reciprocal(ms + 1e-6, approx=False)                        # f32
    # conn from x (no (C,P) temp), scaled by s^2 on the tiny (C,C) tile in f32.
    conn = jnp.einsum("bcp,bdp->bcd", x, x,
                      preferred_element_type=jnp.float32) * (s * s)   # (Bt,C,C)
    # conn is symmetric -> no transpose needed for the second matmul.
    out = jnp.einsum("bcd,bdp->bcp", conn.astype(x.dtype), x,
                     preferred_element_type=jnp.float32)
    o_ref[...] = out.astype(o_ref.dtype)


def _hebb_kernel_mask(x_ref, m_ref, o_ref):
    x = x_ref[...]                                                    # (Bt,C,P)
    xf = x.astype(jnp.float32)
    m = m_ref[...].astype(jnp.float32)                                # (Bt,1,P)
    amp = jnp.sqrt(jnp.sum(xf * xf, axis=1, keepdims=True) + 1e-8)    # (Bt,1,P)
    ms = jnp.sum(m, axis=2, keepdims=True)                            # (Bt,1,1)
    # per-pixel scale on a (1,P) row; avoids a (C,P) divide.
    r = m * pl.reciprocal(amp * ms + 1e-6, approx=False)              # (Bt,1,P)
    y = (xf * r).astype(x.dtype)                                      # (Bt,C,P)
    conn = jnp.einsum("bcp,bdp->bcd", y, y,
                      preferred_element_type=jnp.float32)             # (Bt,C,C)
    out = jnp.einsum("bcd,bdp->bcp", conn.astype(x.dtype), x,
                     preferred_element_type=jnp.float32)
    o_ref[...] = out.astype(o_ref.dtype)


# ------------------------- two-pass P-tiled kernels --------------------------


def _conn_kernel_nomask(x_ref, conn_ref, acc_ref, amp_ref):
    # grid = (B, P // tp); x_ref block: (1, C, tp).
    p = pl.program_id(1)

    @pl.when(p == 0)
    def _():
        acc_ref[...] = jnp.zeros_like(acc_ref)
        amp_ref[...] = jnp.zeros_like(amp_ref)

    x = x_ref[...]
    xf = x.astype(jnp.float32)
    amp = jnp.sqrt(jnp.sum(xf * xf, axis=1, keepdims=True) + 1e-8)    # (1,1,tp)
    amp_ref[...] = amp_ref[...] + jnp.sum(amp, axis=(1, 2), keepdims=True)
    acc_ref[...] += jnp.einsum("bcp,bdp->bcd", x, x,
                               preferred_element_type=jnp.float32)

    @pl.when(p == pl.num_programs(1) - 1)
    def _():
        s = pl.reciprocal(amp_ref[...] + 1e-6, approx=False)          # (1,1,1)
        conn_ref[...] = (acc_ref[...] * (s * s)).astype(conn_ref.dtype)


def _conn_kernel_mask(x_ref, m_ref, ms_ref, conn_ref, acc_ref):
    p = pl.program_id(1)

    @pl.when(p == 0)
    def _():
        acc_ref[...] = jnp.zeros_like(acc_ref)

    x = x_ref[...]                                                    # (1,C,tp)
    xf = x.astype(jnp.float32)
    m = m_ref[...].astype(jnp.float32)                                # (1,1,tp)
    ms = ms_ref[...]                                                  # (1,1,1) f32
    amp = jnp.sqrt(jnp.sum(xf * xf, axis=1, keepdims=True) + 1e-8)
    r = m * pl.reciprocal(amp * ms + 1e-6, approx=False)
    y = (xf * r).astype(x.dtype)
    acc_ref[...] += jnp.einsum("bcp,bdp->bcd", y, y,
                               preferred_element_type=jnp.float32)

    @pl.when(p == pl.num_programs(1) - 1)
    def _():
        conn_ref[...] = acc_ref[...].astype(conn_ref.dtype)


def _apply_kernel(conn_ref, x_ref, o_ref):
    # out_tile[b,c,p] = sum_d conn[b,c,d] x[b,d,p]; conn is symmetric.
    conn = conn_ref[...]                                              # (1,C,C) f32
    x = x_ref[...]                                                    # (1,C,tp)
    out = jnp.einsum("bcd,bdp->bcp", conn.astype(x.dtype), x,
                     preferred_element_type=jnp.float32)
    o_ref[...] = out.astype(o_ref.dtype)


# ------------------------------- planning ------------------------------------


def _tpu_limits():
    """Returns (vmem_limit_bytes, tile_budget_bytes, tensorcores_per_chip)."""
    vmem_cap = 64 * 1024 * 1024   # conservative fallback (assume v7x-size VMEM)
    try:
        info = pltpu.get_tpu_info()
        vmem_cap = int(getattr(info, "vmem_capacity_bytes", vmem_cap))
    except Exception:
        pass
    if vmem_cap <= 64 * 1024 * 1024:
        # v7x: 64 MiB VMEM per TensorCore, 2 TensorCores per chip.
        return 40 * 1024 * 1024, 26 * 1024 * 1024, 2
    # v5e / v6e: 128 MiB VMEM, single TensorCore.
    return 64 * 1024 * 1024, 40 * 1024 * 1024, 1


def _largest_divisor_leq(n, cap):
    cap = max(1, min(n, cap))
    best = 1
    for d in range(1, cap + 1):
        if n % d == 0:
            best = d
    return best


def _pick_batch_tile(B, C, P, itemsize, has_mask, budget, cores):
    # Conservative per-batch-element residency in the fused kernel: x + out
    # blocks double-buffered (native dtype) + ~3 f32 (C,P) temporaries + the
    # (C,C) conn tile + the (1,P) mask/row temporaries.
    per_elem = C * P * (4 * itemsize + 12) + 16 * C * C
    if has_mask:
        per_elem += P * (2 * itemsize + 8)
    cap = max(1, budget // per_elem)
    if cores >= 2 and B >= 2:
        # v7x: keep >= 2 grid blocks so both TensorCores get work.
        cap = min(cap, max(1, B // 2))
    elif B >= 4 and (B // 4) * per_elem >= (2 << 20):
        # single-TC: prefer >= 4 grid steps (pipeline steady state) as long as
        # each step still streams a few MiB.
        cap = min(cap, B // 4)
    return _largest_divisor_leq(B, cap), per_elem


def _pick_p_tile(C, P, itemsize, budget):
    # Per-pixel-column residency in the P-tiled kernels (x tile double
    # buffered + f32 temporaries + mask column) plus fixed conn/acc tiles.
    per_col = C * (2 * itemsize + 8) + (2 * itemsize + 8)
    fixed = 16 * C * C
    best = 128
    for k in range(1, P // 128 + 1):
        tp = 128 * k
        if P % tp != 0 or tp > P // 2:
            continue
        if tp * per_col + fixed <= budget:
            best = tp
    return best


# -------------------------------- wrapper ------------------------------------


def hebb_attention(x_nchw, mask_nchw=None, *, force_two_pass=False):
    """Pallas HebbAttention.forward (NCHW in/out, output in the input dtype)."""
    B, C, H, W = x_nchw.shape
    P = H * W
    dtype = x_nchw.dtype
    itemsize = x_nchw.dtype.itemsize
    x = x_nchw.reshape(B, C, P)          # free reshape, keeps NCHW memory order
    has_mask = mask_nchw is not None
    m = mask_nchw.reshape(B, 1, P) if has_mask else None
    m_itemsize = mask_nchw.dtype.itemsize if has_mask else 0

    vmem_limit, budget, cores = _tpu_limits()
    bt, per_elem = _pick_batch_tile(B, C, P, itemsize, has_mask, budget, cores)
    fits_single = per_elem <= budget
    p_tileable = (P % 128 == 0) and (P >= 256)
    big_b1 = cores >= 2 and B == 1 and C * P * itemsize >= (2 << 20)
    use_two_pass = p_tileable and (force_two_pass or (not fits_single) or big_b1)

    flops = 4 * B * C * C * P
    trans = 2 * B * P

    if not use_two_pass:
        # ------------------- single fused pallas_call -----------------------
        grid = (B // bt,)
        spec_x = pl.BlockSpec((bt, C, P), lambda b: (b, 0, 0))
        cparams = pltpu.CompilerParams(
            dimension_semantics=("parallel",),
            vmem_limit_bytes=vmem_limit,
        )
        ce = pl.CostEstimate(
            flops=flops,
            transcendentals=trans,
            bytes_accessed=2 * B * C * P * itemsize + B * P * m_itemsize,
        )
        if not has_mask:
            out = pl.pallas_call(
                _hebb_kernel_nomask,
                out_shape=jax.ShapeDtypeStruct((B, C, P), dtype),
                grid=grid,
                in_specs=[spec_x],
                out_specs=spec_x,
                compiler_params=cparams,
                cost_estimate=ce,
            )(x)
        else:
            spec_m = pl.BlockSpec((bt, 1, P), lambda b: (b, 0, 0))
            out = pl.pallas_call(
                _hebb_kernel_mask,
                out_shape=jax.ShapeDtypeStruct((B, C, P), dtype),
                grid=grid,
                in_specs=[spec_x, spec_m],
                out_specs=spec_x,
                compiler_params=cparams,
                cost_estimate=ce,
            )(x, m)
        return out.reshape(B, C, H, W)

    # ----------------------- two-pass P-tiled path ---------------------------
    tp = _pick_p_tile(C, P, itemsize, budget)
    nP = P // tp
    grid = (B, nP)
    x_spec = pl.BlockSpec((1, C, tp), lambda b, p: (b, 0, p))
    conn_spec = pl.BlockSpec((1, C, C), lambda b, p: (b, 0, 0))
    cparams1 = pltpu.CompilerParams(
        dimension_semantics=("parallel", "arbitrary"),
        vmem_limit_bytes=vmem_limit,
    )
    cparams2 = pltpu.CompilerParams(
        dimension_semantics=("parallel", "parallel"),
        vmem_limit_bytes=vmem_limit,
    )
    ce1 = pl.CostEstimate(
        flops=2 * B * C * C * P,
        transcendentals=trans,
        bytes_accessed=B * C * P * itemsize + B * P * m_itemsize + B * C * C * 4,
    )
    ce2 = pl.CostEstimate(
        flops=2 * B * C * C * P,
        transcendentals=0,
        bytes_accessed=2 * B * C * P * itemsize + B * C * C * 4,
    )

    if not has_mask:
        conn = pl.pallas_call(
            _conn_kernel_nomask,
            out_shape=jax.ShapeDtypeStruct((B, C, C), jnp.float32),
            grid=grid,
            in_specs=[x_spec],
            out_specs=conn_spec,
            scratch_shapes=[pltpu.VMEM((1, C, C), jnp.float32),
                            pltpu.VMEM((1, 1, 1), jnp.float32)],
            compiler_params=cparams1,
            cost_estimate=ce1,
        )(x)
    else:
        # Global mask_sum needed inside every P tile: cheap (B,1,P) reduction
        # done once here and streamed as a (B,1,1) f32 input.
        ms = jnp.sum(m.astype(jnp.float32), axis=2, keepdims=True)
        m_spec = pl.BlockSpec((1, 1, tp), lambda b, p: (b, 0, p))
        ms_spec = pl.BlockSpec((1, 1, 1), lambda b, p: (b, 0, 0))
        conn = pl.pallas_call(
            _conn_kernel_mask,
            out_shape=jax.ShapeDtypeStruct((B, C, C), jnp.float32),
            grid=grid,
            in_specs=[x_spec, m_spec, ms_spec],
            out_specs=conn_spec,
            scratch_shapes=[pltpu.VMEM((1, C, C), jnp.float32)],
            compiler_params=cparams1,
            cost_estimate=ce1,
        )(x, m, ms)

    out = pl.pallas_call(
        _apply_kernel,
        out_shape=jax.ShapeDtypeStruct((B, C, P), dtype),
        grid=grid,
        in_specs=[conn_spec, x_spec],
        out_specs=x_spec,
        compiler_params=cparams2,
        cost_estimate=ce2,
    )(conn, x)
    return out.reshape(B, C, H, W)


# ------------------------------- reference -----------------------------------


def hebb_attention_ref(x, mask=None):
    """Plain-JAX reference matching the PyTorch module exactly (NCHW, f32)."""
    x = x.astype(jnp.float32)
    if mask is None:
        amp = jnp.sqrt(jnp.sum(x * x, axis=1, keepdims=True) + 1e-8)
        mask_sum = jnp.sum(amp, axis=(2, 3), keepdims=True)
        y = x / (mask_sum + 1e-6)
    else:
        mask = mask.astype(jnp.float32)
        amp = jnp.sqrt(jnp.sum(x * x, axis=1, keepdims=True) + 1e-8)
        mask_sum = jnp.sum(mask, axis=(2, 3), keepdims=True)
        y = x * mask / (amp * mask_sum + 1e-6)
    y_t = jnp.transpose(y, (0, 2, 3, 1))
    conn = jnp.einsum("bhwc,bhwd->bcd", y_t, y_t)
    x_t = jnp.transpose(x, (0, 2, 3, 1))
    out = jnp.einsum("bhwc,bcd->bhwd", x_t, conn)
    return jnp.transpose(out, (0, 3, 1, 2))


if __name__ == "__main__":
    key = jax.random.PRNGKey(0)
    kx, km = jax.random.split(key)

    B, C, H, W = 2, 4, 16, 16
    x = jax.random.normal(kx, (B, C, H, W), dtype=jnp.float32)
    mask = jax.nn.sigmoid(jax.random.normal(km, (B, 1, H, W), dtype=jnp.float32))

    ref = hebb_attention_ref(x)
    ref_m = hebb_attention_ref(x, mask)

    # fused single-pass path (mask=None and masked)
    out = jax.block_until_ready(hebb_attention(x))
    assert out.shape == (B, C, H, W)
    assert jnp.allclose(out, ref, rtol=1e-5, atol=1e-5), "fused mask=None mismatch"

    out_m = jax.block_until_ready(hebb_attention(x, mask))
    assert jnp.allclose(out_m, ref_m, rtol=1e-5, atol=1e-5), "fused masked mismatch"

    # two-pass P-tiled path (v7x capacity / megacore path), forced at small size
    out2 = jax.block_until_ready(hebb_attention(x, force_two_pass=True))
    assert jnp.allclose(out2, ref, rtol=1e-5, atol=1e-5), "two-pass mask=None mismatch"

    out2_m = jax.block_until_ready(hebb_attention(x, mask, force_two_pass=True))
    assert jnp.allclose(out2_m, ref_m, rtol=1e-5, atol=1e-5), "two-pass masked mismatch"

    # bf16 HBM-streaming path (review item): loose sanity check vs f32 reference
    xb = x.astype(jnp.bfloat16)
    outb = jax.block_until_ready(hebb_attention(xb))
    assert outb.dtype == jnp.bfloat16 and outb.shape == (B, C, H, W)
    outb_f32 = outb.astype(jnp.float32)
    assert bool(jnp.all(jnp.isfinite(outb_f32)))
    max_err = float(jnp.max(jnp.abs(outb_f32 - ref)))
    assert max_err < 0.1 * float(jnp.max(jnp.abs(ref))) + 1e-2, "bf16 path sanity failed"

    print("KERNEL_OK")
</pallas_src>

<mosaic_0001>
module attributes {stable_mosaic.version = 11 : i64} {
  func.func @_hebb_kernel_nomask(%arg0: i32, %arg1: memref<1x4x256xf32, #tpu.memory_space<vmem>>, %arg2: memref<1x4x256xf32, #tpu.memory_space<vmem>>) attributes {dimension_semantics = [#tpu.dimension_semantics<parallel>], iteration_bounds = array<i64: 2>, scalar_prefetch = 0 : i64, scratch_operands = 0 : i64, tpu.core_type = #tpu.core_type<tc>, window_params = [{transform_indices = @transform_0, window_bounds = array<i64: 1, 4, 256>}, {transform_indices = @transform_1, window_bounds = array<i64: 1, 4, 256>}]} {
    %c0 = arith.constant 0 : index
    %c0_0 = arith.constant 0 : index
    %c0_1 = arith.constant 0 : index
    %0 = vector.load %arg1[%c0, %c0_0, %c0_1] : memref<1x4x256xf32, #tpu.memory_space<vmem>>, vector<1x4x256xf32>
    %1 = arith.mulf %0, %0 : vector<1x4x256xf32>
    %cst = arith.constant dense<0.000000e+00> : vector<1x256xf32>
    %2 = vector.multi_reduction <add>, %1, %cst [1] : vector<1x4x256xf32> to vector<1x256xf32>
    %3 = vector.shape_cast %2 : vector<1x256xf32> to vector<1x1x256xf32>
    %cst_2 = arith.constant 9.99999993E-9 : f32
    %4 = vector.broadcast %cst_2 : f32 to vector<1x1x256xf32>
    %5 = arith.addf %3, %4 : vector<1x1x256xf32>
    %6 = math.sqrt %5 : vector<1x1x256xf32>
    %cst_3 = arith.constant dense<0.000000e+00> : vector<1x1xf32>
    %7 = vector.multi_reduction <add>, %6, %cst_3 [2] : vector<1x1x256xf32> to vector<1x1xf32>
    %8 = vector.shape_cast %7 : vector<1x1xf32> to vector<1x1x1xf32>
    %cst_4 = arith.constant 9.99999997E-7 : f32
    %9 = vector.broadcast %cst_4 : f32 to vector<1x1x1xf32>
    %10 = arith.addf %8, %9 : vector<1x1x1xf32>
    %11 = tpu.reciprocal %10 : vector<1x1x1xf32> -> vector<1x1x1xf32>
    "tpu.trace_start"() <{level = 10 : i32, message = "bcp,bdp->bcd"}> : () -> ()
    %cst_5 = arith.constant dense<0.000000e+00> : vector<1x4x4xf32>
    %12 = tpu.matmul %0, %0, %cst_5 {dimension_numbers = #tpu.dot_dimension_numbers<[2], [2], [1], [1], [0, 0, 0, 1, 1, 1], [0], [0]>} : vector<1x4x256xf32>, vector<1x4x256xf32>, vector<1x4x4xf32> -> vector<1x4x4xf32>
    "tpu.trace_stop"() : () -> ()
    %13 = arith.mulf %11, %11 : vector<1x1x1xf32>
    %14 = vector.broadcast %13 : vector<1x1x1xf32> to vector<1x4x4xf32>
    %15 = arith.mulf %12, %14 : vector<1x4x4xf32>
    "tpu.trace_start"() <{level = 10 : i32, message = "bcd,bdp->bcp"}> : () -> ()
    %cst_6 = arith.constant dense<0.000000e+00> : vector<1x4x256xf32>
    %16 = tpu.matmul %15, %0, %cst_6 {dimension_numbers = #tpu.dot_dimension_numbers<[2], [1], [1], [2], [0, 0, 0, 1, 1, 2], [0], [0]>} : vector<1x4x4xf32>, vector<1x4x256xf32>, vector<1x4x256xf32> -> vector<1x4x256xf32>
    "tpu.trace_stop"() : () -> ()
    %c0_7 = arith.constant 0 : index
    %c0_8 = arith.constant 0 : index
    %c0_9 = arith.constant 0 : index
    %17 = vector.load %arg2[%c0_7, %c0_8, %c0_9] : memref<1x4x256xf32, #tpu.memory_space<vmem>>, vector<1x4x256xf32>
    tpu.vector_store %arg2[%c0_7, %c0_8, %c0_9], %16 {strides = array<i32>} : memref<1x4x256xf32, #tpu.memory_space<vmem>>, vector<1x4x256xf32>,
    return
  }
  func.func @transform_0(%arg0: i32) -> (i32, i32, i32) {
    %c0_i32 = arith.constant 0 : i32
    %c0_i32_0 = arith.constant 0 : i32
    %c0_i32_1 = arith.constant 0 : i32
    return %arg0, %c0_i32, %c0_i32_0 : i32, i32, i32
  }
  func.func @transform_1(%arg0: i32) -> (i32, i32, i32) {
    %c0_i32 = arith.constant 0 : i32
    %c0_i32_0 = arith.constant 0 : i32
    %c0_i32_1 = arith.constant 0 : i32
    return %arg0, %c0_i32, %c0_i32_0 : i32, i32, i32
  }
}

</mosaic_0001>

<bundles_post_ra>
// kernel: tpu_custom_call.1
= control target key start
LH: loop header
LB: loop body
LE: loop exit
PB: predicated region body
PF: predicated region fallthrough
CT: control target
= control target key end

     0   :  { %6 = vsyncpa [#allocation3], 0  ;;  %s743_s0 = inlined_call_operand.hbm [shape: f32[2,4,256], index: 0, kind: input, shape index: {}]   ;;  %s744_s1 = inlined_call_operand.hbm [shape: f32[2,4,256], index: 1, kind: output, shape index: {}]  }
   0x1   :  { %8 = vsyncpa [#allocation3 + $0x1], 0 }
   0x2   :  { %9 = vsyncpa [#allocation4], 0 }
   0x3   :  { %11 = vsyncpa [#allocation4 + $0x1], 0  ;;  %s598_s6 = smov 0   ;;  %s600_s7 = smov 0  }
   0x4   :  { %s602_s8 = smov 0   ;;  %s604_s9 = smov 0  }
   0x5 LB: > { %s619_s10 = sadd.s32 4294967295, %s583_s9   ;;  %s418_s11 = sadd.s32 4294967294, %s583_s9   ;;  %s583_s9 = sphi %s604_s9, %s761_s9   ;;  %s579_s8 = sphi %s602_s8, %s760_s8   ;;  %s575_s7 = sphi %s600_s7, %s759_s7   ;;  %s571_s6 = sphi %s598_s6, %s758_s6  }
   0x6   : > { %s623_s12 = sadd.s32 1, %s583_s9   ;;  %s24_s13 = sadd.s32 1, %s579_s8 }
   0x7   : > { %s21_s14 = ssub.s32 %s583_s9, %s623_s12  ;;  %p31_p0 = scmp.ne.s32.totalorder %s579_s8, %s575_s7 }
   0x8   : > { %p22_p1 = scmp.eq.s32.totalorder %s21_s14, 0  ;;  %p32_p2 = scmp.eq.s32.totalorder %s583_s9, 0 }
   0x9   : > { %p37_p3 = scmp.ne.s32.totalorder %s575_s7, %s571_s6  ;;  %p38_p4 = scmp.eq.s32.totalorder %s619_s10, 0 }
   0xa   : > { %s635_s15 = scalar_select %p22_p1, %s579_s8, %s24_s13  }
   0xb   : > { %p637_p5 = por %p32_p2, %p31_p0  ;;  %p641_p6 = por %p38_p4, %p37_p3 }
   0xc   : > { %p61_p7 = scmp.eq.s32.totalorder %s619_s10, 1  ;;  %p67_p8 = scmp.eq.s32.totalorder %s418_s11, 1 }
   0xd   : > { %s748_s17 = scalar_select %p641_p6, 1, 0 }
   0xe   : > { %p449_p10 = scmp.lt.s32.totalorder %s583_s9, 2  ;;  %p648_p11 = por %p61_p7, %p31_p0 }
   0xf   : > { %p652_p12 = por %p67_p8, %p37_p3  ;;  %s87_s20 = sand.u32 1, %s579_s8  }
  0x10   : > { %s749_s18 = scalar_select %p648_p11, 1, 0 }
  0x11   : > { %s750_s19 = scalar_select %p652_p12, 1, 0 }
  0x12   : > { %s435_s21 = sshll.u32 %s583_s9, 7  ;;  %s421_s22 = sshll.u32 %s87_s20, 3 }
  0x13   : > { %s661_s25 = scalar_lea.hbm %s743_s0, %s435_s21  ;;  %s91_s26 = scalar_lea.vmem [#allocation2], %s421_s22 }
  0x14   : > { %s99_s27 = sshll.u32 %s91_s26, 4  ;;  %p665_p13 = pnand %p449_p10, %p637_p5  ;;  %s669_s27 = int_to_ptr.vmem [resolvable:$true] %s99_s27 }
  0x15   : > { %s88_s29 = scalar_lea.sflag [#allocation3], %s87_s20  ;;  %s491_s30 = scalar_lea.hbm %s661_s25, 128 }
  0x16   : > { %p492_p2 = scmp.ne.s32.totalorder %s661_s25, %s491_s30  ;;  %p493_p3 = pneg %p665_p13 }
  0x17   : > { %s496_s4 = scalar_lea.hbm %s743_s0, 256  ;;  %p497_p5 = scmp.lt.s32.totalorder %s661_s25, %s743_s0 }
  0x18   : > { %p494_p4 = pnand %p493_p3, %p492_p2  ;;  %p498_p8 = scmp.lt.s32.totalorder %s496_s4, %s491_s30 }
  0x1a   : > { %p495_p7 = pneg %p494_p4  ;;  %p499_p10 = por %p498_p8, %p497_p5 }
  0x1c   : > { %p500_p9 = pnand %p499_p10, %p495_p7 }
  0x1e   : > { %503 = shalt.err (!%p500_p9)
}
  0x1f   : > { %s504_s13 = scalar_lea.vmem %s669_s27, 128  ;;  %s585_s14 = smov [#allocation2]  }
  0x20   : > { %p505_p0 = scmp.ne.s32.totalorder %s669_s27, %s504_s13  ;;  %s509_s16 = sshll.u32 %s585_s14, 4  ;;  %s510_s16 = int_to_ptr.vmem [resolvable:$false] %s509_s16 }
  0x21   : > { %s511_s20 = scalar_lea.vmem %s510_s16, 256  ;;  %p512_p4 = scmp.lt.s32.totalorder %s669_s27, %s510_s16 }
  0x22   : > { %p507_p1 = pnand %p505_p0, %p493_p3  ;;  %p513_p12 = scmp.lt.s32.totalorder %s511_s20, %s504_s13 }
  0x24   : > { %p508_p2 = pneg %p507_p1  ;;  %p514_p11 = por %p513_p12, %p512_p4 }
  0x26   : > { %p515_p6 = pnand %p514_p11, %p508_p2 }
  0x28   : > { %518 = shalt.err (!%p515_p6)
}
  0x29   : > { %444 = dma.hbm_to_vmem [thread:$0]  (!%p665_p13), %s661_s25, 128, %s669_s27, %s88_s29  }
  0x2a   : > { %p752_p9 = scmp.lt.s32.totalorder %s583_s9, 3  ;;  %p753_p7 = scmp.ge.s32.totalorder %s583_s9, 1 }
  0x2c   : > { %p105_p0 = pnand %p753_p7, %p752_p9 }
  0x2d   : > { %s696_s21 = sand.u32 (!%p105_p0), 1, %s575_s7   ;;  %p754_p6 = scmp.ne.s32.totalorder (!%p105_p0), %s748_s17, 0 }
  0x2e   : > { %108 = sbr.rel (%p105_p0) target bundleno = 464 (0x1d0), region = 24  ;;  %s425_s22 = sshll.u32 (!%p105_p0), %s696_s21, 3 }
  0x2f   : > { %s111_s23 = scalar_lea.sflag (!%p105_p0), [#allocation3], %s696_s21  ;;  %s114_s24 = scalar_lea.vmem (!%p105_p0), [#allocation2], %s425_s22 }
  0x33   : > { %562 = dma.done.wait (%p754_p6), %s111_s23, 128  }
  0x34   : > { %564 = vsyncadd (%p754_p6), %s111_s23, 4294967168  ;;  %v133_v0 = vld [vmem:[%s114_s24] sm:$0xff]  ;;  %vm138_vm0 = vcmask 1043456   ;;  %v586_v31 = vmov 0.0   ;;  %vm249_vm5 = vcmask 31744   ;;  %s436_s17 = sshll.u32 %s619_s10, 7 }
  0x35   : > { %v134_v1 = vmul.f32 %v133_v0, %v133_v0  ;;  %v175_v2 = vcombine.high %v133_v0, %v133_v0  ;;  %321 = vmatprep.mubr.f32.mxu1 %v586_v31  ;;  %s132_s25 = scalar_lea.vmem [#allocation5], %s425_s22  ;;  %s346_s29 = scalar_lea.hbm %s744_s1, %s436_s17 }
  0x36   : > { %s348_s26 = sshll.u32 %s132_s25, 4  ;;  %s334_s30 = scalar_lea.sflag [#allocation4], %s696_s21  ;;  %s349_s26 = int_to_ptr.vmem [resolvable:$true] %s348_s26 }
  0x37   : > { %v136_v3 = vcombine.high %v134_v1, %v134_v1  ;;  %v139_v4 = vsel %vm138_vm0, %v134_v1, 0.0  ;;  %207 = vmatprep.subr.mxu0 %v175_v2  ;;  %241 = vmatprep.mubr.f32.mxu0 %v175_v2  ;;  %s519_s2 = scalar_lea.vmem %s349_s26, 128  ;;  %p755_p12 = scmp.ne.s32.totalorder %s749_s18, 0 }
  0x38   : > { %v140_v5 = vrot.slane %v139_v4, 4  ;;  %208 = vmatpush1.xpose.msra.mxu0 %v133_v0  ;;  %427 = vmatprep.subr.msk.mxu1 %vm138_vm0, %v175_v2  ;;  %p520_p11 = scmp.ne.s32.totalorder %s349_s26, %s519_s2  ;;  %s587_s3 = smov [#allocation5]  }
  0x39   : > { %v146_v6 = vsel %vm138_vm0, %v136_v3, 0.0  ;;  %428 = vmatpush1.msk.msra.mxu1 %vm138_vm0, %v133_v0  ;;  %s523_s4 = sshll.u32 %s587_s3, 4  ;;  %s524_s4 = int_to_ptr.vmem [resolvable:$false] %s523_s4 }
  0x3a   : > { %v141_v7 = vadd.f32 %v140_v5, %v139_v4  ;;  %v147_v8 = vrot.slane %v146_v6, 4  ;;  %p521_p13 = pnand %p520_p11, %p755_p12  ;;  %s525_s10 = scalar_lea.vmem %s524_s4, 256 }
  0x3b   : > { %242 = vmatmul.mubr.f32.vlgmr.msra.gmra.mxu0 %v133_v0  ;;  %p526_p3 = scmp.lt.s32.totalorder %s349_s26, %s524_s4  ;;  %p527_p5 = scmp.lt.s32.totalorder %s525_s10, %s519_s2 }
  0x3c   : > { %v142_v9 = vrot.slane %v141_v7, 2  ;;  %v148_v10 = vadd.f32 %v147_v8, %v146_v6  ;;  %p522_p1 = pneg %p521_p13 }
  0x3d   : > { %p528_p8 = por %p527_p5, %p526_p3 }
  0x3e   : > { %v143_v11 = vadd.f32 %v142_v9, %v141_v7  ;;  %v149_v12 = vrot.slane %v148_v10, 2 }
  0x3f   : > { %p529_p10 = pnand %p528_p8, %p522_p1 }
  0x40   : > { %v144_v13 = vrot.slane %v143_v11, 1  ;;  %v150_v14 = vadd.f32 %v149_v12, %v148_v10 }
  0x42   : > { %v145_v15 = vadd.f32 %v144_v13, %v143_v11  ;;  %v151_v16 = vrot.slane %v150_v14, 1 }
  0x44   : > { %v152_v17 = vadd.f32 %v151_v16, %v150_v14  ;;  %v153_v18 = vadd.f32 1e-08, %v145_v15 }
  0x46   : > { %v154_v19 = vadd.f32 1e-08, %v152_v17  ;;  %485 = vrsqrt.f32 %v153_v18  ;;  %vm157_vm1 = vcmp.eq.f32.partialorder %v153_v18, inf  ;;  %v160_v21 = vand.u32 2147483648, %v153_v18 }
  0x47   : > { %vm159_vm2 = vcmp.eq.f32.partialorder %v153_v18, 0.0 }
  0x48   : > { %487 = vrsqrt.f32 %v154_v19  ;;  %vm164_vm3 = vcmp.eq.f32.partialorder %v154_v19, inf  ;;  %v167_v24 = vand.u32 2147483648, %v154_v19  ;;  %vm166_vm4 = vcmp.eq.f32.partialorder %v154_v19, 0.0 }
  0x53   : > { %v486_v20 = vpop.eup %485 }
  0x54   : > { %v156_v22 = vmul.f32 %v486_v20, %v153_v18 }
  0x55   : > { %v488_v23 = vpop.eup %487 }
  0x56   : > { %v158_v25 = vsel %vm157_vm1, %v153_v18, %v156_v22  ;;  %v163_v26 = vmul.f32 %v488_v23, %v154_v19 }
  0x57   : > { %v161_v27 = vsel %vm159_vm2, %v160_v21, %v158_v25 }
  0x58   : > { %v165_v28 = vsel %vm164_vm3, %v154_v19, %v163_v26 }
  0x59   : > { %v168_v29 = vsel %vm166_vm4, %v167_v24, %v165_v28 }
  0x5a   : > { %v169_v30 = vadd.f32 %v168_v29, %v161_v27 }
  0x5c   : > { %170 = vadd.xlane.f32.xlu0 %v169_v30 }
  0xe5   : > { %v171_v32 = vpop.xlane.xlu0 %170 }
  0xe6   : > { %v172_v33 = vadd.f32 1e-06, %v171_v32 }
  0xe8   : > { %489 = vrcp.f32 %v172_v33 }
  0xf5   : > { %v490_v34 = vpop.eup %489 }
  0xf6   : > { %v247_v35 = vmul.f32 %v490_v34, %v490_v34 }
  0xfb   : > { %v243_v36 = vpop.f32.mrf.mxu0 }
  0xfc   : > { %v248_v37 = vmul.f32 %v247_v35, %v243_v36 }
  0xfd   : > { %v245_v38 = vpop.f32.mrf.mxu0 }
  0xfe   : > { %429 = vmatmul.mubr.msk.f32.vlgmr.msra.gmra.mxu1 %vm249_vm5, %v248_v37 }
 0x1be   : > { %v323_v39 = vpop.f32.mrf.mxu1 }
 0x1c0   : > { %v325_v40 = vpop.f32.mrf.mxu1 }
 0x1c1   : > { %v330_v41 = vcombine.low %v323_v39, %v325_v40 }
 0x1c3   : > { %332 = vst [vmem:[%s132_s25] sm:$0xff] %v330_v41 }
 0x1c4   : > { %532 = shalt.err (!%p529_p10)
}
 0x1c5   : > { %s533_s5 = scalar_lea.hbm %s346_s29, 128  ;;  %s537_s14 = scalar_lea.hbm %s744_s1, 256 }
 0x1c6   : > { %p534_p2 = scmp.ne.s32.totalorder %s346_s29, %s533_s5  ;;  %p538_p7 = scmp.lt.s32.totalorder %s346_s29, %s744_s1 }
 0x1c7   : > { %p539_p0 = scmp.lt.s32.totalorder %s537_s14, %s533_s5 }
 0x1c8   : > { %p535_p4 = pnand %p534_p2, %p755_p12 }
 0x1c9   : > { %p540_p6 = por %p539_p0, %p538_p7 }
 0x1ca   : > { %p536_p9 = pneg %p535_p4 }
 0x1cc   : > { %p541_p11 = pnand %p540_p6, %p536_p9 }
 0x1ce   : > { %544 = shalt.err (!%p541_p11)
}
 0x1cf   : > { %439 = dma.vmem_to_hbm [thread:$0]  (%p755_p12), %s349_s26, 128, %s346_s29, %s334_s30  }
 0x1d0 PF: > { %s360_s21 = sand.u32 1, %s571_s6   ;;  %p756_p13 = scmp.ne.s32.totalorder %s750_s19, 0 }
 0x1d1   : > { %p757_p1 = scmp.ge.s32.totalorder %s583_s9, 2  ;;  %s361_s22 = scalar_lea.sflag [#allocation4], %s360_s21 }
 0x1d3   : > { %p446_p3 = pnand %p757_p1, %p756_p13 }
 0x1d5   : > { %p447_p5 = pneg %p446_p3 }
 0x1d7   : > { %566 = dma.done.wait (%p447_p5), %s361_s22, 128  }
 0x1d8   : > { %568 = vsyncadd (%p447_p5), %s361_s22, 4294967168  ;;  %p14_p8 = scmp.ge.s32.totalorder %s623_s12, 4   ;;  %s758_s6 = smov %s575_s7 }
 0x1d9   : > { %s759_s7 = smov %s579_s8  ;;  %s760_s8 = smov %s635_s15 }
 0x1da   : > { %s761_s9 = smov %s623_s12  ;;  %16 = sbr.rel (!%p14_p8) target bundleno = 5 (0x5), region = 69 }
 0x1df   :  { %366 = vsyncpa [#allocation3], 1 }
 0x1e0   :  { %368 = vsyncpa [#allocation3 + $0x1], 1 }
 0x1e1   :  { %369 = vsyncpa [#allocation4], 1 }
 0x1e2   :  { %371 = vsyncpa [#allocation4 + $0x1], 1 }

</bundles_post_ra>
